<compile_context>
chip_gen: v7x
topology: tpu7x:2x2x1
jax: 0.10.0
libtpu: 0.0.40
codegen_flags: <defaults>
</compile_context>

<pallas_src>
import functools
import math

import jax
import jax.numpy as jnp
from jax.experimental import pallas as pl
from jax.experimental.pallas import tpu as pltpu

CHANNEL = 128                 # channel_cnn == channel_fc == 128
KSIZE = 4                     # Conv1d kernel size
L = 5                         # conv output length (S=8) -> matches fc1 in_features
N_ACT = 128                   # lane-padded activation width (2*L*K + 2 real cols)
N_MID = 2 * CHANNEL * L + 2 * CHANNEL   # 1536 == fc1 in_features
CHUNK = 512                   # stage-1/fc1 fusion chunk (1536 = 3 * 512)
A_PAD = 128                   # lane-padded action dimension


# --------------------------------------------------------------------------
# Kernel: 3 bf16 MXU dots (stage-1 fused conv/fc, fc1, fc3) + f32 softmax.
# --------------------------------------------------------------------------
def actor_kernel(act_ref, ws1_ref, b1_ref, ws2_ref, b2_ref, out_ref):
    # act_ref: (bt, 128) bf16     ws1_ref: (128, 1536) bf16
    # b1_ref : (1, 1536) f32      ws2_ref: (1664, 128) bf16 (fc1 rows + fc3 rows)
    # b2_ref : (2, 128)  f32      out_ref: (bt, 128) f32
    act = act_ref[...]                                   # (bt, 128) bf16
    bt = act.shape[0]
    b2 = b2_ref[...]                                     # (2, 128) f32

    # Fused stage-1 + fc1: chunk the 1536 hidden dim, never materialize
    # the full (bt, 1536) intermediate.
    h = jnp.zeros((bt, CHANNEL), jnp.float32)
    for c in range(N_MID // CHUNK):                      # 3 static (unrolled) chunks
        lo = c * CHUNK
        x = jnp.maximum(
            jnp.dot(act, ws1_ref[:, lo:lo + CHUNK],
                    preferred_element_type=jnp.float32)
            + b1_ref[:, lo:lo + CHUNK],
            0.0)                                         # (bt, CHUNK) f32
        h = h + jnp.dot(x.astype(jnp.bfloat16),
                        ws2_ref[lo:lo + CHUNK, :],
                        preferred_element_type=jnp.float32)

    # fc1 bias + ReLU (f32)
    h = jnp.maximum(h + b2[0:1, :], 0.0)                 # (bt, 128) f32

    # fc3 (lane-padded to 128; padded lanes carry -1e30 bias -> exp()==0)
    logits = jnp.dot(h.astype(jnp.bfloat16),
                     ws2_ref[N_MID:N_MID + CHANNEL, :],
                     preferred_element_type=jnp.float32) + b2[1:2, :]

    # Softmax over the (padded) action dimension, all in f32.
    m = jnp.max(logits, axis=1, keepdims=True)
    e = jnp.exp(logits - m)
    inv = pl.reciprocal(jnp.sum(e, axis=1, keepdims=True), approx=False)
    out_ref[...] = e * inv


# --------------------------------------------------------------------------
# One-time slab preparation (per parameter update) — hoisted out of the
# per-call path per the performance review.
# --------------------------------------------------------------------------
def prepare_actor_slabs(p, action_space):
    C = CHANNEL
    A = action_space

    # Stage-1 fused weight (128, 1536): conv1 / conv2 block-diagonal over the
    # 5 conv positions (column layout c*L + l, matching the reference's
    # channel-major flatten), plus actor_fc_3 / actor_fc_2 rows.
    eye_l = jnp.eye(L, dtype=jnp.float32)
    w_th = jnp.einsum('ck,lm->lkcm', p['conv1_w'][:, 0, :], eye_l).reshape(L * KSIZE, C * L)
    w_dl = jnp.einsum('ck,lm->lkcm', p['conv2_w'][:, 0, :], eye_l).reshape(L * KSIZE, C * L)
    ws1 = jnp.zeros((N_ACT, N_MID), jnp.float32)
    ws1 = ws1.at[0:L * KSIZE, 0:C * L].set(w_th)
    ws1 = ws1.at[L * KSIZE:2 * L * KSIZE, C * L:2 * C * L].set(w_dl)
    ws1 = ws1.at[2 * L * KSIZE, 2 * C * L:2 * C * L + C].set(p['afc3_w'][:, 0])
    ws1 = ws1.at[2 * L * KSIZE + 1, 2 * C * L + C:2 * C * L + 2 * C].set(p['afc2_w'][:, 0])

    # Stage-1 biases, kept in f32 (added before the stage-1 ReLU).
    b1 = jnp.concatenate([jnp.repeat(p['conv1_b'], L),
                          jnp.repeat(p['conv2_b'], L),
                          p['afc3_b'], p['afc2_b']]).reshape(1, N_MID)

    # fc1 / fc3 weight slab (1664, 128): rows [0,1536) = fc1_w.T,
    # rows [1536,1664) = fc3_w.T lane-padded to 128.
    w3_pad = jnp.zeros((C, A_PAD), jnp.float32).at[:, :A].set(p['fc3_w'].T)
    ws2 = jnp.concatenate([p['fc1_w'].T, w3_pad], axis=0)

    # f32 bias rows: row 0 = fc1 bias, row 1 = fc3 bias (+ -1e30 on pad lanes).
    b3_pad = jnp.full((A_PAD,), -1e30, jnp.float32).at[:A].set(p['fc3_b'])
    b2 = jnp.stack([p['fc1_b'], b3_pad], axis=0)         # (2, 128)

    return {
        'ws1': ws1.astype(jnp.bfloat16),
        'b1': b1.astype(jnp.float32),
        'ws2': ws2.astype(jnp.bfloat16),
        'b2': b2.astype(jnp.float32),
    }


def _round_up(x, m):
    return ((x + m - 1) // m) * m


# --------------------------------------------------------------------------
# Per-call forward: pack the activation slab, launch the kernel.
# --------------------------------------------------------------------------
def actor_forward(inputs, slabs, action_space, *, block_b=1024):
    """inputs: (B, C>=5, S=8) f32; slabs from prepare_actor_slabs.
    Returns softmax policy (B, action_space)."""
    B, _, S = inputs.shape
    assert S - KSIZE + 1 == L, "spatial size must give conv length 5 (fc1 shape)"
    A = action_space

    # ---- activation slab (B, 128), lane-dense, bf16 ----
    th = inputs[:, 2, :]       # throughputs_batch (B, S)
    dl = inputs[:, 3, :]       # download_time_batch (B, S)
    th_patch = jnp.stack([th[:, l:l + KSIZE] for l in range(L)],
                         axis=1).reshape(B, L * KSIZE)              # (B, 20)
    dl_patch = jnp.stack([dl[:, l:l + KSIZE] for l in range(L)],
                         axis=1).reshape(B, L * KSIZE)              # (B, 20)
    act = jnp.concatenate([
        th_patch, dl_patch,
        inputs[:, 0:1, -1],                 # -> actor_fc_3
        inputs[:, 1:2, -1],                 # -> actor_fc_2
        jnp.zeros((B, N_ACT - (2 * L * KSIZE + 2)), jnp.float32),
    ], axis=1).astype(jnp.bfloat16)         # (B, 128)

    # ---- batch tiling: >=2 grid steps when possible (v7x dual-TC split),
    # blocks capped for VMEM, rows padded to a multiple of 16 (bf16 tiles) ----
    block_b = max(16, (block_b // 16) * 16)
    bt = max(16, min(block_b, _round_up(pl.cdiv(B, 2), 16)))
    num_blocks = pl.cdiv(B, bt)
    b_padded = num_blocks * bt
    if b_padded != B:
        act = jnp.pad(act, ((0, b_padded - B), (0, 0)))

    out = pl.pallas_call(
        actor_kernel,
        out_shape=jax.ShapeDtypeStruct((b_padded, A_PAD), jnp.float32),
        grid=(num_blocks,),
        in_specs=[
            pl.BlockSpec((bt, N_ACT), lambda i: (i, 0)),
            pl.BlockSpec((N_ACT, N_MID), lambda i: (0, 0)),      # resident
            pl.BlockSpec((1, N_MID), lambda i: (0, 0)),          # resident
            pl.BlockSpec((N_MID + CHANNEL, A_PAD), lambda i: (0, 0)),  # resident
            pl.BlockSpec((2, A_PAD), lambda i: (0, 0)),          # resident
        ],
        out_specs=pl.BlockSpec((bt, A_PAD), lambda i: (i, 0)),
        compiler_params=pltpu.CompilerParams(
            dimension_semantics=("parallel",),
            vmem_limit_bytes=32 * 1024 * 1024),
    )(act, slabs['ws1'], slabs['b1'], slabs['ws2'], slabs['b2'])
    return out[:B, :A]


# --------------------------------------------------------------------------
# Pure-JAX reference reproducing the PyTorch forward exactly (f32, HIGHEST).
# --------------------------------------------------------------------------
def actor_reference(inputs, p, action_space):
    hi = jax.lax.Precision.HIGHEST
    B, _, S = inputs.shape
    th = inputs[:, 2, :]
    dl = inputs[:, 3, :]

    def conv1d(x, w, b):  # torch Conv1d(1, 128, 4), NCW
        patches = jnp.stack([x[:, l:l + KSIZE] for l in range(L)], axis=1)  # (B,L,K)
        return jnp.einsum('blk,ck->bcl', patches, w[:, 0, :], precision=hi) \
            + b[None, :, None]

    x1 = jax.nn.relu(conv1d(th, p['conv1_w'], p['conv1_b']))        # (B,128,L)
    x2 = jax.nn.relu(conv1d(dl, p['conv2_w'], p['conv2_b']))
    x4 = jax.nn.relu(jnp.dot(inputs[:, 0:1, -1], p['afc3_w'].T, precision=hi)
                     + p['afc3_b'])
    x5 = jax.nn.relu(jnp.dot(inputs[:, 1:2, -1], p['afc2_w'].T, precision=hi)
                     + p['afc2_b'])
    x = jnp.concatenate(
        [x1.reshape(B, -1), x2.reshape(B, -1), x4, x5], axis=1)     # (B, 1536)
    h = jax.nn.relu(jnp.dot(x, p['fc1_w'].T, precision=hi) + p['fc1_b'])
    logits = jnp.dot(h, p['fc3_w'].T, precision=hi) + p['fc3_b']
    return jax.nn.softmax(logits, axis=1)


def init_params(key, action_space):
    """Deterministic synthetic parameters (torch default uniform init shapes)."""
    C = CHANNEL
    incoming = 2 * C * L + 2 * C  # 1536

    def u(k, shape, fan_in):
        bound = 1.0 / math.sqrt(fan_in)
        return jax.random.uniform(k, shape, jnp.float32, -bound, bound)

    ks = jax.random.split(key, 12)
    return {
        'conv1_w': u(ks[0], (C, 1, KSIZE), KSIZE), 'conv1_b': u(ks[1], (C,), KSIZE),
        'conv2_w': u(ks[2], (C, 1, KSIZE), KSIZE), 'conv2_b': u(ks[3], (C,), KSIZE),
        'afc2_w': u(ks[4], (C, 1), 1),             'afc2_b': u(ks[5], (C,), 1),
        'afc3_w': u(ks[6], (C, 1), 1),             'afc3_b': u(ks[7], (C,), 1),
        'fc1_w': u(ks[8], (C, incoming), incoming), 'fc1_b': u(ks[9], (C,), incoming),
        'fc3_w': u(ks[10], (action_space, C), C),  'fc3_b': u(ks[11], (action_space,), C),
    }


if __name__ == "__main__":
    ACTION_SPACE = 6
    B, C_IN, S = 2, 6, 8   # S=8 -> conv output length 5, matching fc1 in_features

    key = jax.random.PRNGKey(0)
    k_param, k_in = jax.random.split(key)
    params = init_params(k_param, ACTION_SPACE)
    inputs = jax.random.normal(k_in, (B, C_IN, S), jnp.float32)

    # Slabs built once (per parameter update), outside the hot per-call path.
    slabs = prepare_actor_slabs(params, ACTION_SPACE)
    slabs = jax.tree_util.tree_map(jax.block_until_ready, slabs)

    fwd = jax.jit(functools.partial(actor_forward, action_space=ACTION_SPACE))
    out = jax.block_until_ready(fwd(inputs, slabs))
    ref = actor_reference(inputs, params, ACTION_SPACE)

    assert out.shape == (B, ACTION_SPACE)
    assert bool(jnp.allclose(jnp.sum(out, axis=1), 1.0, atol=1e-4))
    assert bool(jnp.allclose(out, ref, atol=1e-3, rtol=1e-3)), (out, ref)
    # NOTE: sizes_batch (inputs[:, 4:5, :action_space]) is sliced in the torch
    # forward but never used, so it is intentionally not consumed here.
    print("KERNEL_OK")
</pallas_src>

<mosaic_0001>
module attributes {stable_mosaic.version = 11 : i64} {
  func.func @actor_kernel(%arg0: i32, %arg1: memref<16x128xbf16, #tpu.memory_space<vmem>>, %arg2: memref<128x1536xbf16, #tpu.memory_space<vmem>>, %arg3: memref<1x1536xf32, #tpu.memory_space<vmem>>, %arg4: memref<1664x128xbf16, #tpu.memory_space<vmem>>, %arg5: memref<2x128xf32, #tpu.memory_space<vmem>>, %arg6: memref<16x128xf32, #tpu.memory_space<vmem>>) attributes {dimension_semantics = [#tpu.dimension_semantics<parallel>], iteration_bounds = array<i64: 1>, scalar_prefetch = 0 : i64, scratch_operands = 0 : i64, tpu.core_type = #tpu.core_type<tc>, window_params = [{transform_indices = @transform_0, window_bounds = array<i64: 16, 128>}, {pipeline_mode = #tpu.pipeline_mode<synchronous>, transform_indices = @transform_1, window_bounds = array<i64: 128, 1536>}, {pipeline_mode = #tpu.pipeline_mode<synchronous>, transform_indices = @transform_2, window_bounds = array<i64: 1, 1536>}, {pipeline_mode = #tpu.pipeline_mode<synchronous>, transform_indices = @transform_3, window_bounds = array<i64: 1664, 128>}, {pipeline_mode = #tpu.pipeline_mode<synchronous>, transform_indices = @transform_4, window_bounds = array<i64: 2, 128>}, {transform_indices = @transform_5, window_bounds = array<i64: 16, 128>}]} {
    %c0 = arith.constant 0 : index
    %c0_0 = arith.constant 0 : index
    %0 = vector.load %arg1[%c0, %c0_0] : memref<16x128xbf16, #tpu.memory_space<vmem>>, vector<16x128xbf16>
    %c0_1 = arith.constant 0 : index
    %c0_2 = arith.constant 0 : index
    %1 = vector.load %arg5[%c0_1, %c0_2] : memref<2x128xf32, #tpu.memory_space<vmem>>, vector<2x128xf32>
    %cst = arith.constant 0.000000e+00 : f32
    %2 = vector.broadcast %cst : f32 to vector<16x128xf32>
    %c0_3 = arith.constant 0 : index
    %c0_4 = arith.constant 0 : index
    %3 = vector.load %arg2[%c0_3, %c0_4] : memref<128x1536xbf16, #tpu.memory_space<vmem>>, vector<128x512xbf16>
    %cst_5 = arith.constant dense<0.000000e+00> : vector<16x512xf32>
    %4 = tpu.matmul %0, %3, %cst_5 {dimension_numbers = #tpu.dot_dimension_numbers<[1], [0], [0], [1], [0, 0, 1, 1], [], []>} : vector<16x128xbf16>, vector<128x512xbf16>, vector<16x512xf32> -> vector<16x512xf32>
    %c0_6 = arith.constant 0 : index
    %c0_7 = arith.constant 0 : index
    %5 = vector.load %arg3[%c0_6, %c0_7] : memref<1x1536xf32, #tpu.memory_space<vmem>>, vector<1x512xf32>
    %6 = vector.broadcast %5 : vector<1x512xf32> to vector<16x512xf32>
    %7 = arith.addf %4, %6 : vector<16x512xf32>
    %cst_8 = arith.constant 0.000000e+00 : f32
    %8 = vector.broadcast %cst_8 : f32 to vector<16x512xf32>
    %9 = arith.maximumf %7, %8 : vector<16x512xf32>
    %10 = arith.truncf %9 : vector<16x512xf32> to vector<16x512xbf16>
    %c0_9 = arith.constant 0 : index
    %c0_10 = arith.constant 0 : index
    %11 = vector.load %arg4[%c0_9, %c0_10] : memref<1664x128xbf16, #tpu.memory_space<vmem>>, vector<512x128xbf16>
    %cst_11 = arith.constant dense<0.000000e+00> : vector<16x128xf32>
    %12 = tpu.matmul %10, %11, %cst_11 {dimension_numbers = #tpu.dot_dimension_numbers<[1], [0], [0], [1], [0, 0, 1, 1], [], []>} : vector<16x512xbf16>, vector<512x128xbf16>, vector<16x128xf32> -> vector<16x128xf32>
    %13 = arith.addf %2, %12 : vector<16x128xf32>
    %c0_12 = arith.constant 0 : index
    %c512 = arith.constant 512 : index
    %14 = vector.load %arg2[%c0_12, %c512] : memref<128x1536xbf16, #tpu.memory_space<vmem>>, vector<128x512xbf16>
    %cst_13 = arith.constant dense<0.000000e+00> : vector<16x512xf32>
    %15 = tpu.matmul %0, %14, %cst_13 {dimension_numbers = #tpu.dot_dimension_numbers<[1], [0], [0], [1], [0, 0, 1, 1], [], []>} : vector<16x128xbf16>, vector<128x512xbf16>, vector<16x512xf32> -> vector<16x512xf32>
    %c0_14 = arith.constant 0 : index
    %c512_15 = arith.constant 512 : index
    %16 = vector.load %arg3[%c0_14, %c512_15] : memref<1x1536xf32, #tpu.memory_space<vmem>>, vector<1x512xf32>
    %17 = vector.broadcast %16 : vector<1x512xf32> to vector<16x512xf32>
    %18 = arith.addf %15, %17 : vector<16x512xf32>
    %cst_16 = arith.constant 0.000000e+00 : f32
    %19 = vector.broadcast %cst_16 : f32 to vector<16x512xf32>
    %20 = arith.maximumf %18, %19 : vector<16x512xf32>
    %21 = arith.truncf %20 : vector<16x512xf32> to vector<16x512xbf16>
    %c512_17 = arith.constant 512 : index
    %c0_18 = arith.constant 0 : index
    %22 = vector.load %arg4[%c512_17, %c0_18] : memref<1664x128xbf16, #tpu.memory_space<vmem>>, vector<512x128xbf16>
    %cst_19 = arith.constant dense<0.000000e+00> : vector<16x128xf32>
    %23 = tpu.matmul %21, %22, %cst_19 {dimension_numbers = #tpu.dot_dimension_numbers<[1], [0], [0], [1], [0, 0, 1, 1], [], []>} : vector<16x512xbf16>, vector<512x128xbf16>, vector<16x128xf32> -> vector<16x128xf32>
    %24 = arith.addf %13, %23 : vector<16x128xf32>
    %c0_20 = arith.constant 0 : index
    %c1024 = arith.constant 1024 : index
    %25 = vector.load %arg2[%c0_20, %c1024] : memref<128x1536xbf16, #tpu.memory_space<vmem>>, vector<128x512xbf16>
    %cst_21 = arith.constant dense<0.000000e+00> : vector<16x512xf32>
    %26 = tpu.matmul %0, %25, %cst_21 {dimension_numbers = #tpu.dot_dimension_numbers<[1], [0], [0], [1], [0, 0, 1, 1], [], []>} : vector<16x128xbf16>, vector<128x512xbf16>, vector<16x512xf32> -> vector<16x512xf32>
    %c0_22 = arith.constant 0 : index
    %c1024_23 = arith.constant 1024 : index
    %27 = vector.load %arg3[%c0_22, %c1024_23] : memref<1x1536xf32, #tpu.memory_space<vmem>>, vector<1x512xf32>
    %28 = vector.broadcast %27 : vector<1x512xf32> to vector<16x512xf32>
    %29 = arith.addf %26, %28 : vector<16x512xf32>
    %cst_24 = arith.constant 0.000000e+00 : f32
    %30 = vector.broadcast %cst_24 : f32 to vector<16x512xf32>
    %31 = arith.maximumf %29, %30 : vector<16x512xf32>
    %32 = arith.truncf %31 : vector<16x512xf32> to vector<16x512xbf16>
    %c1024_25 = arith.constant 1024 : index
    %c0_26 = arith.constant 0 : index
    %33 = vector.load %arg4[%c1024_25, %c0_26] : memref<1664x128xbf16, #tpu.memory_space<vmem>>, vector<512x128xbf16>
    %cst_27 = arith.constant dense<0.000000e+00> : vector<16x128xf32>
    %34 = tpu.matmul %32, %33, %cst_27 {dimension_numbers = #tpu.dot_dimension_numbers<[1], [0], [0], [1], [0, 0, 1, 1], [], []>} : vector<16x512xbf16>, vector<512x128xbf16>, vector<16x128xf32> -> vector<16x128xf32>
    %35 = arith.addf %24, %34 : vector<16x128xf32>
    %36 = vector.extract_strided_slice %1 {offsets = [0, 0], sizes = [1, 128], strides = [1, 1]} : vector<2x128xf32> to vector<1x128xf32>
    %37 = vector.broadcast %36 : vector<1x128xf32> to vector<16x128xf32>
    %38 = arith.addf %35, %37 : vector<16x128xf32>
    %cst_28 = arith.constant 0.000000e+00 : f32
    %39 = vector.broadcast %cst_28 : f32 to vector<16x128xf32>
    %40 = arith.maximumf %38, %39 : vector<16x128xf32>
    %41 = arith.truncf %40 : vector<16x128xf32> to vector<16x128xbf16>
    %c1536 = arith.constant 1536 : index
    %c0_29 = arith.constant 0 : index
    %42 = vector.load %arg4[%c1536, %c0_29] : memref<1664x128xbf16, #tpu.memory_space<vmem>>, vector<128x128xbf16>
    %cst_30 = arith.constant dense<0.000000e+00> : vector<16x128xf32>
    %43 = tpu.matmul %41, %42, %cst_30 {dimension_numbers = #tpu.dot_dimension_numbers<[1], [0], [0], [1], [0, 0, 1, 1], [], []>} : vector<16x128xbf16>, vector<128x128xbf16>, vector<16x128xf32> -> vector<16x128xf32>
    %44 = vector.extract_strided_slice %1 {offsets = [1, 0], sizes = [1, 128], strides = [1, 1]} : vector<2x128xf32> to vector<1x128xf32>
    %45 = vector.broadcast %44 : vector<1x128xf32> to vector<16x128xf32>
    %46 = arith.addf %43, %45 : vector<16x128xf32>
    %cst_31 = arith.constant dense<0xFF800000> : vector<16xf32>
    %47 = vector.multi_reduction <maximumf>, %46, %cst_31 [1] : vector<16x128xf32> to vector<16xf32>
    %48 = vector.shape_cast %47 : vector<16xf32> to vector<16x1xf32>
    %49 = vector.broadcast %48 : vector<16x1xf32> to vector<16x128xf32>
    %50 = arith.subf %46, %49 : vector<16x128xf32>
    %51 = math.exp %50 : vector<16x128xf32>
    %cst_32 = arith.constant dense<0.000000e+00> : vector<16xf32>
    %52 = vector.multi_reduction <add>, %51, %cst_32 [1] : vector<16x128xf32> to vector<16xf32>
    %53 = vector.shape_cast %52 : vector<16xf32> to vector<16x1xf32>
    %54 = tpu.reciprocal %53 : vector<16x1xf32> -> vector<16x1xf32>
    %55 = vector.broadcast %54 : vector<16x1xf32> to vector<16x128xf32>
    %56 = arith.mulf %51, %55 : vector<16x128xf32>
    %c0_33 = arith.constant 0 : index
    %c0_34 = arith.constant 0 : index
    %57 = vector.load %arg6[%c0_33, %c0_34] : memref<16x128xf32, #tpu.memory_space<vmem>>, vector<16x128xf32>
    tpu.vector_store %arg6[%c0_33, %c0_34], %56 {strides = array<i32>} : memref<16x128xf32, #tpu.memory_space<vmem>>, vector<16x128xf32>,
    return
  }
  func.func @transform_0(%arg0: i32) -> (i32, i32) {
    %c0_i32 = arith.constant 0 : i32
    %c0_i32_0 = arith.constant 0 : i32
    return %arg0, %c0_i32 : i32, i32
  }
  func.func @transform_1(%arg0: i32) -> (i32, i32) {
    %c0_i32 = arith.constant 0 : i32
    %c0_i32_0 = arith.constant 0 : i32
    %c0_i32_1 = arith.constant 0 : i32
    return %c0_i32, %c0_i32_0 : i32, i32
  }
  func.func @transform_2(%arg0: i32) -> (i32, i32) {
    %c0_i32 = arith.constant 0 : i32
    %c0_i32_0 = arith.constant 0 : i32
    %c0_i32_1 = arith.constant 0 : i32
    return %c0_i32, %c0_i32_0 : i32, i32
  }
  func.func @transform_3(%arg0: i32) -> (i32, i32) {
    %c0_i32 = arith.constant 0 : i32
    %c0_i32_0 = arith.constant 0 : i32
    %c0_i32_1 = arith.constant 0 : i32
    return %c0_i32, %c0_i32_0 : i32, i32
  }
  func.func @transform_4(%arg0: i32) -> (i32, i32) {
    %c0_i32 = arith.constant 0 : i32
    %c0_i32_0 = arith.constant 0 : i32
    %c0_i32_1 = arith.constant 0 : i32
    return %c0_i32, %c0_i32_0 : i32, i32
  }
  func.func @transform_5(%arg0: i32) -> (i32, i32) {
    %c0_i32 = arith.constant 0 : i32
    %c0_i32_0 = arith.constant 0 : i32
    return %arg0, %c0_i32 : i32, i32
  }
}

</mosaic_0001>

<bundles_post_ra>
// kernel: actor_forward.1
= control target key start
LH: loop header
LB: loop body
LE: loop exit
PB: predicated region body
PF: predicated region fallthrough
CT: control target
= control target key end

     0   :  { %10 = vsyncpa [#allocation3], 0  ;;  %s2973_s0 = inlined_call_operand.vmem [shape: bf16[16,128], index: 0, kind: input, shape index: {}]   ;;  %s2974_s1 = inlined_call_operand.hbm [shape: bf16[128,1536], index: 1, kind: input, shape index: {}]   ;;  %s2975_s2 = inlined_call_operand.vmem [shape: f32[1,1536], index: 2, kind: input, shape index: {}]   ;;  %s2976_s3 = inlined_call_operand.hbm [shape: bf16[1664,128], index: 3, kind: input, shape index: {}]   ;;  %s2977_s4 = inlined_call_operand.vmem [shape: f32[2,128], index: 4, kind: input, shape index: {}]   ;;  %s2978_s5 = inlined_call_operand.vmem [shape: f32[16,128], index: 5, kind: output, shape index: {}]  }
   0x1   :  { %11 = vsyncpa [#allocation5], 0  ;;  %s2831_s18 = smov [#allocation2]   ;;  %s2783_s22 = scalar_lea.hbm %s2974_s1, 12288 }
   0x2   :  { %s19_s19 = sshll.u32 %s2831_s18, 4  ;;  %p2784_p0 = scmp.ne.s32.totalorder %s2974_s1, %s2783_s22  ;;  %s20_s19 = int_to_ptr.vmem [resolvable:$true] %s19_s19 }
   0x3   :  { %p2787_p1 = scmp.lt.u32.totalorder %s2783_s22, %s2974_s1 }
   0x5   :  { %p2789_p2 = pnand %p2787_p1, %p2784_p0 }
   0x7   :  { %2792 = shalt.err (!%p2789_p2)
}
   0x8   :  { %s2793_s27 = scalar_lea.vmem %s20_s19, 12288  ;;  %p2798_p4 = scmp.lt.s32.totalorder %s20_s19, %s20_s19 }
   0x9   :  { %p2794_p3 = scmp.ne.s32.totalorder %s20_s19, %s2793_s27  ;;  %p2799_p5 = scmp.lt.s32.totalorder %s2793_s27, %s2793_s27 }
   0xb   :  { %p2800_p6 = por %p2799_p5, %p2798_p4 }
   0xd   :  { %p2801_p7 = pnand %p2800_p6, %p2794_p3 }
   0xf   :  { %2804 = shalt.err (!%p2801_p7)
}
  0x10   :  { %s2832_s28 = smov 768   ;;  %s2833_s29 = smov 48  }
  0x11   :  { %25 = dma.hbm_to_vmem [thread:$0]  %s2974_s1, 12288, %s20_s19, [#allocation3], %s2832_s28, %s2832_s28, %s2833_s29  }
  0x12   :  { %s2834_s7 = smov [#allocation4]   ;;  %s2805_s11 = scalar_lea.hbm %s2976_s3, 13312 }
  0x13   :  { %s33_s8 = sshll.u32 %s2834_s7, 4  ;;  %p2806_p8 = scmp.ne.s32.totalorder %s2976_s3, %s2805_s11  ;;  %s34_s8 = int_to_ptr.vmem [resolvable:$true] %s33_s8 }
  0x14   :  { %p2809_p9 = scmp.lt.u32.totalorder %s2805_s11, %s2976_s3 }
  0x16   :  { %p2811_p10 = pnand %p2809_p9, %p2806_p8 }
  0x18   :  { %2814 = shalt.err (!%p2811_p10)
}
  0x19   :  { %s2815_s16 = scalar_lea.vmem %s34_s8, 13312  ;;  %p2820_p12 = scmp.lt.s32.totalorder %s34_s8, %s34_s8 }
  0x1a   :  { %p2816_p11 = scmp.ne.s32.totalorder %s34_s8, %s2815_s16  ;;  %p2821_p13 = scmp.lt.s32.totalorder %s2815_s16, %s2815_s16 }
  0x1c   :  { %p2822_p0 = por %p2821_p13, %p2820_p12 }
  0x1e   :  { %p2823_p1 = pnand %p2822_p0, %p2816_p11 }
  0x20   :  { %2826 = shalt.err (!%p2823_p1)
}
  0x21   :  { %s2835_s1 = smov 64   ;;  %s2836_s17 = smov 4  }
  0x22   :  { %39 = dma.hbm_to_vmem [thread:$0]  %s2976_s3, 13312, %s34_s8, [#allocation5], %s2835_s1, %s2835_s1, %s2836_s17  }
  0x23   :  { %2827 = dma.done.wait [#allocation3], 12288  }
  0x24   :  { %2828 = vsyncadd [#allocation3], 4294955008 }
  0x25   :  { %2829 = dma.done.wait [#allocation5], 13312  }
  0x26   :  { %2830 = vsyncadd [#allocation5], 4294953984  ;;  %v2837_v0 = vmov 0   ;;  %v2525_v1 = vld [vmem:[#allocation2 + $0x4] ss:$48 sps:$4 sm:$0xff]   ;;  %vm2839_vm0 = vmmov 0  }
  0x27   :  { %304 = vmatprep.mubr.bf16.mxu0 %v2837_v0  ;;  %347 = vmatprep.mubr.bf16.mxu1 %v2837_v0  ;;  %v2527_v2 = vld [vmem:[#allocation2 + $0xc] ss:$48 sps:$4 sm:$0xff]   ;;  %v2529_v3 = vld [vmem:[#allocation2] ss:$48 sps:$4 sm:$0xff]   ;;  %v2530_v4 = vld [vmem:[#allocation2 + $0x8] ss:$48 sps:$4 sm:$0xff]  }
  0x28   :  { %272 = vmatprep.subr.bf16.mxu0 %v2525_v1  ;;  %315 = vmatprep.subr.bf16.mxu1 %v2527_v2  ;;  %v2531_v5 = vld [vmem:[#allocation2 + $0x64] ss:$48 sps:$4 sm:$0xff]   ;;  %v2533_v6 = vld [vmem:[#allocation2 + $0x6c] ss:$48 sps:$4 sm:$0xff]   ;;  %v2535_v7 = vld [vmem:[#allocation2 + $0x60] ss:$48 sps:$4 sm:$0xff]  }
  0x29   :  { %273 = vmatpush1.bf16.msra.mxu0 %v2529_v3  ;;  %316 = vmatpush1.bf16.msra.mxu1 %v2530_v4  ;;  %v2536_v8 = vld [vmem:[#allocation2 + $0x68] ss:$48 sps:$4 sm:$0xff]   ;;  %v2537_v9 = vld [vmem:[#allocation2 + $0xc4] ss:$48 sps:$4 sm:$0xff]   ;;  %v2539_v10 = vld [vmem:[#allocation2 + $0xcc] ss:$48 sps:$4 sm:$0xff]  }
  0x2a   :  { %274 = vmatprep.subr.bf16.mxu0 %v2531_v5  ;;  %317 = vmatprep.subr.bf16.mxu1 %v2533_v6  ;;  %v2541_v11 = vld [vmem:[#allocation2 + $0xc0] ss:$48 sps:$4 sm:$0xff]   ;;  %v2542_v12 = vld [vmem:[#allocation2 + $0xc8] ss:$48 sps:$4 sm:$0xff]   ;;  %v2543_v13 = vld [vmem:[#allocation2 + $0x124] ss:$48 sps:$4 sm:$0xff]  }
  0x2b   :  { %v2545_v14 = vld [vmem:[#allocation2 + $0x12c] ss:$48 sps:$4 sm:$0xff]   ;;  %v2547_v15 = vld [vmem:[#allocation2 + $0x120] ss:$48 sps:$4 sm:$0xff]   ;;  %v2548_v16 = vld [vmem:[#allocation2 + $0x128] ss:$48 sps:$4 sm:$0xff]  }
  0x2c   :  { %v2549_v17 = vld [vmem:[#allocation2 + $0x184] ss:$48 sps:$4 sm:$0xff]   ;;  %v2551_v18 = vld [vmem:[#allocation2 + $0x18c] ss:$48 sps:$4 sm:$0xff]   ;;  %v2553_v19 = vld [vmem:[#allocation2 + $0x180] ss:$48 sps:$4 sm:$0xff]  }
  0x2d   :  { %275 = vmatpush1.bf16.msra.mxu0 %v2535_v7  ;;  %318 = vmatpush1.bf16.msra.mxu1 %v2536_v8  ;;  %v2554_v20 = vld [vmem:[#allocation2 + $0x188] ss:$48 sps:$4 sm:$0xff]   ;;  %v2555_v21 = vld [vmem:[#allocation2 + $0x1e4] ss:$48 sps:$4 sm:$0xff]   ;;  %v2557_v22 = vld [vmem:[#allocation2 + $0x1ec] ss:$48 sps:$4 sm:$0xff]  }
  0x2e   :  { %276 = vmatprep.subr.bf16.mxu0 %v2537_v9  ;;  %319 = vmatprep.subr.bf16.mxu1 %v2539_v10  ;;  %v2559_v23 = vld [vmem:[#allocation2 + $0x1e0] ss:$48 sps:$4 sm:$0xff]   ;;  %v2560_v24 = vld [vmem:[#allocation2 + $0x1e8] ss:$48 sps:$4 sm:$0xff]   ;;  %v2561_v25 = vld [vmem:[#allocation2 + $0x244] ss:$48 sps:$4 sm:$0xff]  }
  0x2f   :  { %v2563_v26 = vld [vmem:[#allocation2 + $0x24c] ss:$48 sps:$4 sm:$0xff]   ;;  %v2565_v27 = vld [vmem:[#allocation2 + $0x240] ss:$48 sps:$4 sm:$0xff]   ;;  %v2566_v28 = vld [vmem:[#allocation2 + $0x248] ss:$48 sps:$4 sm:$0xff]  }
  0x30   :  { %v2567_v29 = vld [vmem:[#allocation2 + $0x2a4] ss:$48 sps:$4 sm:$0xff]   ;;  %v2569_v30 = vld [vmem:[#allocation2 + $0x2ac] ss:$48 sps:$4 sm:$0xff]   ;;  %v2571_v31 = vld [vmem:[#allocation2 + $0x2a0] ss:$48 sps:$4 sm:$0xff]  }
  0x31   :  { %277 = vmatpush1.bf16.msra.mxu0 %v2541_v11  ;;  %320 = vmatpush1.bf16.msra.mxu1 %v2542_v12  ;;  %v2572_v32 = vld [vmem:[#allocation2 + $0x2a8] ss:$48 sps:$4 sm:$0xff]   ;;  %v2576_v33 = vld [vmem:[#allocation2 + $0x14] ss:$48 sps:$4 sm:$0xff]   ;;  %v2579_v34 = vld [vmem:[#allocation2 + $0x1c] ss:$48 sps:$4 sm:$0xff]  }
  0x32   :  { %278 = vmatprep.subr.bf16.mxu0 %v2543_v13  ;;  %321 = vmatprep.subr.bf16.mxu1 %v2545_v14  ;;  %v2899_v35 = vld [vmem:[%s2973_s0] sm:$0xff]   ;;  %v2577_v37 = vld [vmem:[#allocation2 + $0x18] ss:$48 sps:$4 sm:$0xff]   ;;  %v2585_v39 = vld [vmem:[#allocation2 + $0x7c] ss:$48 sps:$4 sm:$0xff]  }
  0x33   :  { %v2574_v36 = vld [vmem:[#allocation2 + $0x10] ss:$48 sps:$4 sm:$0xff]   ;;  %v2582_v38 = vld [vmem:[#allocation2 + $0x74] ss:$48 sps:$4 sm:$0xff]   ;;  %v2583_v41 = vld [vmem:[#allocation2 + $0x78] ss:$48 sps:$4 sm:$0xff]  }
  0x34   :  { %v2580_v40 = vld [vmem:[#allocation2 + $0x70] ss:$48 sps:$4 sm:$0xff]   ;;  %v2588_v42 = vld [vmem:[#allocation2 + $0xd4] ss:$48 sps:$4 sm:$0xff]   ;;  %v2591_v43 = vld [vmem:[#allocation2 + $0xdc] ss:$48 sps:$4 sm:$0xff]  }
  0x35   :  { %279 = vmatpush1.bf16.msra.mxu0 %v2547_v15  ;;  %322 = vmatpush1.bf16.msra.mxu1 %v2548_v16  ;;  %v2586_v44 = vld [vmem:[#allocation2 + $0xd0] ss:$48 sps:$4 sm:$0xff]   ;;  %v2589_v45 = vld [vmem:[#allocation2 + $0xd8] ss:$48 sps:$4 sm:$0xff]   ;;  %v2594_v46 = vld [vmem:[#allocation2 + $0x134] ss:$48 sps:$4 sm:$0xff]  }
  0x36   :  { %280 = vmatprep.subr.bf16.mxu0 %v2549_v17  ;;  %323 = vmatprep.subr.bf16.mxu1 %v2551_v18  ;;  %v2597_v47 = vld [vmem:[#allocation2 + $0x13c] ss:$48 sps:$4 sm:$0xff]   ;;  %v2592_v48 = vld [vmem:[#allocation2 + $0x130] ss:$48 sps:$4 sm:$0xff]   ;;  %v2595_v49 = vld [vmem:[#allocation2 + $0x138] ss:$48 sps:$4 sm:$0xff]  }
  0x37   :  { %v2600_v50 = vld [vmem:[#allocation2 + $0x194] ss:$48 sps:$4 sm:$0xff]   ;;  %v2603_v51 = vld [vmem:[#allocation2 + $0x19c] ss:$48 sps:$4 sm:$0xff]   ;;  %v2598_v52 = vld [vmem:[#allocation2 + $0x190] ss:$48 sps:$4 sm:$0xff]  }
  0x38   :  { %v2601_v53 = vld [vmem:[#allocation2 + $0x198] ss:$48 sps:$4 sm:$0xff]   ;;  %v2606_v54 = vld [vmem:[#allocation2 + $0x1f4] ss:$48 sps:$4 sm:$0xff]   ;;  %v2609_v55 = vld [vmem:[#allocation2 + $0x1fc] ss:$48 sps:$4 sm:$0xff]  }
  0x39   :  { %281 = vmatpush1.bf16.msra.mxu0 %v2553_v19  ;;  %324 = vmatpush1.bf16.msra.mxu1 %v2554_v20  ;;  %v2604_v56 = vld [vmem:[#allocation2 + $0x1f0] ss:$48 sps:$4 sm:$0xff]   ;;  %v2607_v57 = vld [vmem:[#allocation2 + $0x1f8] ss:$48 sps:$4 sm:$0xff]   ;;  %v2612_v58 = vld [vmem:[#allocation2 + $0x254] ss:$48 sps:$4 sm:$0xff]  }
  0x3a   :  { %282 = vmatprep.subr.bf16.mxu0 %v2555_v21  ;;  %325 = vmatprep.subr.bf16.mxu1 %v2557_v22  ;;  %v2615_v59 = vld [vmem:[#allocation2 + $0x25c] ss:$48 sps:$4 sm:$0xff]   ;;  %v2610_v60 = vld [vmem:[#allocation2 + $0x250] ss:$48 sps:$4 sm:$0xff]   ;;  %v2613_v61 = vld [vmem:[#allocation2 + $0x258] ss:$48 sps:$4 sm:$0xff]  }
  0x3b   :  { %v2618_v62 = vld [vmem:[#allocation2 + $0x2b4] ss:$48 sps:$4 sm:$0xff]   ;;  %v2621_v63 = vld [vmem:[#allocation2 + $0x2bc] ss:$48 sps:$4 sm:$0xff]   ;;  %v2616_v1 = vld [vmem:[#allocation2 + $0x2b0] ss:$48 sps:$4 sm:$0xff]  }
  0x3c   :  { %v2619_v2 = vld [vmem:[#allocation2 + $0x2b8] ss:$48 sps:$4 sm:$0xff]   ;;  %v2622_v3 = vld [vmem:[#allocation4 + $0x140] sm:$0xff]   ;;  %v2630_v11 = vld [vmem:[#allocation4 + $0x150] sm:$0xff]  }
  0x3d   :  { %283 = vmatpush1.bf16.msra.mxu0 %v2559_v23  ;;  %326 = vmatpush1.bf16.msra.mxu1 %v2560_v24  ;;  %v2623_v4 = vld [vmem:[#allocation4 + $0x1c0] sm:$0xff]   ;;  %v2626_v7 = vld [vmem:[#allocation4 + $0x148] sm:$0xff]   ;;  %v2631_v12 = vld [vmem:[#allocation4 + $0x1d0] sm:$0xff]  }
  0x3e   :  { %284 = vmatprep.subr.bf16.mxu0 %v2561_v25  ;;  %327 = vmatprep.subr.bf16.mxu1 %v2563_v26  ;;  %v2624_v5 = vld [vmem:[#allocation4 + $0x100] sm:$0xff]   ;;  %v2627_v8 = vld [vmem:[#allocation4 + $0x1c8] sm:$0xff]   ;;  %v2632_v13 = vld [vmem:[#allocation4 + $0x110] sm:$0xff]  }
  0x3f   :  { %v2625_v6 = vld [vmem:[#allocation4 + $0x180] sm:$0xff]   ;;  %v2628_v9 = vld [vmem:[#allocation4 + $0x108] sm:$0xff]   ;;  %v2633_v14 = vld [vmem:[#allocation4 + $0x190] sm:$0xff]  }
  0x40   :  { %v2629_v10 = vld [vmem:[#allocation4 + $0x188] sm:$0xff]   ;;  %v2634_v15 = vld [vmem:[#allocation4 + $0x158] sm:$0xff]   ;;  %v2638_v19 = vld [vmem:[#allocation4 + $0x160] sm:$0xff]  }
  0x41   :  { %285 = vmatpush1.bf16.msra.mxu0 %v2565_v27  ;;  %328 = vmatpush1.bf16.msra.mxu1 %v2566_v28  ;;  %v2635_v16 = vld [vmem:[#allocation4 + $0x1d8] sm:$0xff]   ;;  %v2639_v20 = vld [vmem:[#allocation4 + $0x1e0] sm:$0xff]   ;;  %v2642_v23 = vld [vmem:[#allocation4 + $0x168] sm:$0xff]  }
  0x42   :  { %286 = vmatprep.subr.bf16.mxu0 %v2567_v29  ;;  %329 = vmatprep.subr.bf16.mxu1 %v2569_v30  ;;  %v2636_v17 = vld [vmem:[#allocation4 + $0x118] sm:$0xff]   ;;  %v2640_v21 = vld [vmem:[#allocation4 + $0x120] sm:$0xff]   ;;  %v2643_v24 = vld [vmem:[#allocation4 + $0x1e8] sm:$0xff]  }
  0x43   :  { %v2637_v18 = vld [vmem:[#allocation4 + $0x198] sm:$0xff]   ;;  %v2641_v22 = vld [vmem:[#allocation4 + $0x1a0] sm:$0xff]   ;;  %v2644_v25 = vld [vmem:[#allocation4 + $0x128] sm:$0xff]  }
  0x44   :  { %v2645_v26 = vld [vmem:[#allocation4 + $0x1a8] sm:$0xff]   ;;  %v2646_v27 = vld [vmem:[#allocation4 + $0x170] sm:$0xff]  }
  0x45   :  { %287 = vmatpush1.bf16.msra.mxu0 %v2571_v31  ;;  %330 = vmatpush1.bf16.msra.mxu1 %v2572_v32  ;;  %v2647_v28 = vld [vmem:[#allocation4 + $0x1f0] sm:$0xff]   ;;  %v2650_v31 = vld [vmem:[#allocation4 + $0x178] sm:$0xff]  }
  0x46   :  { %648 = vmatprep.subr.bf16.mxu0 %v2576_v33  ;;  %691 = vmatprep.subr.bf16.mxu1 %v2579_v34  ;;  %v2648_v29 = vld [vmem:[#allocation4 + $0x130] sm:$0xff]   ;;  %v2651_v32 = vld [vmem:[#allocation4 + $0x1f8] sm:$0xff]  }
  0x47   :  { %v2649_v30 = vld [vmem:[#allocation4 + $0x1b0] sm:$0xff]   ;;  %v2652_v33 = vld [vmem:[#allocation4 + $0x138] sm:$0xff]  }
  0x48   :  { %305 = vmatmul.mubr.bf16.vlgmr.msra.gmra.mrb[0].mxu0 %v2899_v35  ;;  %348 = vmatmul.mubr.bf16.vlgmr.msra.gmra.mrb[0].mxu1 %v2899_v35  ;;  %v2653_v34 = vld [vmem:[#allocation4 + $0x1b8] sm:$0xff]  }
  0x49   :  { %649 = vmatpush1.bf16.msra.mxu0 %v2574_v36  ;;  %692 = vmatpush1.bf16.msra.mxu1 %v2577_v37  ;;  %v2655_v36 = vld [vmem:[#allocation4 + $0xc0] sm:$0xff]   ;;  %v86_v37 = vlaneseq }
  0x4a   :  { %650 = vmatprep.subr.bf16.mxu0 %v2582_v38  ;;  %693 = vmatprep.subr.bf16.mxu1 %v2585_v39 }
  0x4b   :  { %680 = vmatprep.mubr.bf16.mxu0 %v2837_v0  ;;  %723 = vmatprep.mubr.bf16.mxu1 %v2837_v0  ;;  %v87_v38 = vshrl.u32 %v86_v37, 7 }
  0x4d   :  { %651 = vmatpush1.bf16.msra.mxu0 %v2580_v40  ;;  %694 = vmatpush1.bf16.msra.mxu1 %v2583_v41  ;;  %v2907_v39 = vsub.s32 0, %v87_v38  ;;  %v2909_v40 = vsub.s32 2, %v87_v38  ;;  %v84_v41 = vld [vmem:[%s2975_s2] sm:$0xf] }
  0x4e   :  { %652 = vmatprep.subr.bf16.mxu0 %v2588_v42  ;;  %695 = vmatprep.subr.bf16.mxu1 %v2591_v43  ;;  %v2914_v42 = vsub.s32 1, %v87_v38  ;;  %v2916_v43 = vsub.s32 3, %v87_v38 }
  0x51   :  { %653 = vmatpush1.bf16.msra.mxu0 %v2586_v44  ;;  %696 = vmatpush1.bf16.msra.mxu1 %v2589_v45  ;;  %v89_v44 = vrot.slane %v84_v41, %v2907_v39  ;;  %v97_v45 = vrot.slane %v84_v41, %v2909_v40 }
  0x52   :  { %654 = vmatprep.subr.bf16.mxu0 %v2594_v46  ;;  %697 = vmatprep.subr.bf16.mxu1 %v2597_v47  ;;  %v93_v46 = vrot.slane %v84_v41, %v2914_v42  ;;  %v101_v47 = vrot.slane %v84_v41, %v2916_v43 }
  0x55   :  { %655 = vmatpush1.bf16.msra.mxu0 %v2592_v48  ;;  %698 = vmatpush1.bf16.msra.mxu1 %v2595_v49 }
  0x56   :  { %656 = vmatprep.subr.bf16.mxu0 %v2600_v50  ;;  %699 = vmatprep.subr.bf16.mxu1 %v2603_v51 }
  0x59   :  { %657 = vmatpush1.bf16.msra.mxu0 %v2598_v52  ;;  %700 = vmatpush1.bf16.msra.mxu1 %v2601_v53 }
  0x5a   :  { %658 = vmatprep.subr.bf16.mxu0 %v2606_v54  ;;  %701 = vmatprep.subr.bf16.mxu1 %v2609_v55 }
  0x5d   :  { %659 = vmatpush1.bf16.msra.mxu0 %v2604_v56  ;;  %702 = vmatpush1.bf16.msra.mxu1 %v2607_v57 }
  0x5e   :  { %660 = vmatprep.subr.bf16.mxu0 %v2612_v58  ;;  %703 = vmatprep.subr.bf16.mxu1 %v2615_v59 }
  0x61   :  { %661 = vmatpush1.bf16.msra.mxu0 %v2610_v60  ;;  %704 = vmatpush1.bf16.msra.mxu1 %v2613_v61 }
  0x62   :  { %662 = vmatprep.subr.bf16.mxu0 %v2618_v62  ;;  %705 = vmatprep.subr.bf16.mxu1 %v2621_v63 }
  0x65   :  { %663 = vmatpush1.bf16.msra.mxu0 %v2616_v1  ;;  %706 = vmatpush1.bf16.msra.mxu1 %v2619_v2 }
  0x66   :  { %2355 = vmatprep.subr.bf16.mxu0 %v2622_v3  ;;  %2377 = vmatprep.subr.bf16.mxu1 %v2623_v4 }
  0x68   :  { %681 = vmatmul.mubr.bf16.vlgmr.msra.gmra.mrb[4].mxu0 %v2899_v35  ;;  %724 = vmatmul.mubr.bf16.vlgmr.msra.gmra.mrb[4].mxu1 %v2899_v35  ;;  %v2654_v35 = vld [vmem:[#allocation4 + $0x40] sm:$0xff]  }
  0x69   :  { %2356 = vmatpush3.bf16.msra.mxu0 %v2624_v5  ;;  %2378 = vmatpush3.bf16.msra.mxu1 %v2625_v6 }
  0x6a   :  { %2357 = vmatprep.subr.bf16.mxu0 %v2626_v7  ;;  %2379 = vmatprep.subr.bf16.mxu1 %v2627_v8 }
  0x6d   :  { %2358 = vmatpush3.bf16.msra.mxu0 %v2628_v9  ;;  %2380 = vmatpush3.bf16.msra.mxu1 %v2629_v10 }
  0x6e   :  { %2359 = vmatprep.subr.bf16.mxu0 %v2630_v11  ;;  %2381 = vmatprep.subr.bf16.mxu1 %v2631_v12 }
  0x71   :  { %2360 = vmatpush3.bf16.msra.mxu0 %v2632_v13  ;;  %2382 = vmatpush3.bf16.msra.mxu1 %v2633_v14  ;;  %v466_v13 = vld [vmem:[%s2975_s2 + $0x4] sm:$0xf] }
  0x72   :  { %2361 = vmatprep.subr.bf16.mxu0 %v2634_v15  ;;  %2383 = vmatprep.subr.bf16.mxu1 %v2635_v16  ;;  %v471_v14 = vrot.slane %v466_v13, %v2907_v39  ;;  %v479_v15 = vrot.slane %v466_v13, %v2909_v40  ;;  %v475_v16 = vrot.slane %v466_v13, %v2914_v42 }
  0x75   :  { %2362 = vmatpush3.bf16.msra.mxu0 %v2636_v17  ;;  %2384 = vmatpush3.bf16.msra.mxu1 %v2637_v18  ;;  %v483_v17 = vrot.slane %v466_v13, %v2916_v43  ;;  %v2680_v13 = vld [vmem:[#allocation4 + $0x30] sm:$0xff]  }
  0x76   :  { %2363 = vmatprep.subr.bf16.mxu0 %v2638_v19  ;;  %2385 = vmatprep.subr.bf16.mxu1 %v2639_v20 }
  0x79   :  { %2364 = vmatpush3.bf16.msra.mxu0 %v2640_v21  ;;  %2386 = vmatpush3.bf16.msra.mxu1 %v2641_v22 }
  0x7a   :  { %2365 = vmatprep.subr.bf16.mxu0 %v2642_v23  ;;  %2387 = vmatprep.subr.bf16.mxu1 %v2643_v24 }
  0x7d   :  { %2366 = vmatpush3.bf16.msra.mxu0 %v2644_v25  ;;  %2388 = vmatpush3.bf16.msra.mxu1 %v2645_v26 }
  0x7e   :  { %2367 = vmatprep.subr.bf16.mxu0 %v2646_v27  ;;  %2389 = vmatprep.subr.bf16.mxu1 %v2647_v28 }
  0x81   :  { %2368 = vmatpush3.bf16.msra.mxu0 %v2648_v29  ;;  %2390 = vmatpush3.bf16.msra.mxu1 %v2649_v30 }
  0x82   :  { %2369 = vmatprep.subr.bf16.mxu0 %v2650_v31  ;;  %2391 = vmatprep.subr.bf16.mxu1 %v2651_v32 }
  0x85   :  { %2370 = vmatpush3.bf16.msra.mxu0 %v2652_v33  ;;  %2392 = vmatpush3.bf16.msra.mxu1 %v2653_v34 }
  0x86   :  { %2399 = vmatprep.subr.bf16.mxu0 %v2654_v35  ;;  %2421 = vmatprep.subr.bf16.mxu1 %v2655_v36 }
 0x11b   :  { %v306_v48 = vpop.f32.mrb[0].mxu0  ;;  %v349_v49 = vpop.f32.mrb[0].mxu1 }
 0x11c   :  { %v307_v50 = vadd.f32 %v306_v48, %v89_v44  ;;  %v350_v51 = vadd.f32 %v349_v49, %v97_v45  ;;  %v308_v52 = vpop.f32.mrb[1].mxu0  ;;  %v351_v53 = vpop.f32.mrb[1].mxu1 }
 0x11d   :  { %v309_v54 = vadd.f32 %v308_v52, %v93_v46  ;;  %v352_v55 = vadd.f32 %v351_v53, %v101_v47  ;;  %v310_v56 = vpop.f32.mrb[2].mxu0  ;;  %v353_v57 = vpop.f32.mrb[2].mxu1  ;;  %v2658_v52 = vld [vmem:[#allocation4 + $0x48] sm:$0xff]  }
 0x11e   :  { %v358_v58 = vmax.f32 %v307_v50, 0.0  ;;  %v360_v59 = vmax.f32 %v350_v51, 0.0  ;;  %v311_v60 = vadd.f32 %v310_v56, %v89_v44  ;;  %v354_v61 = vadd.f32 %v353_v57, %v97_v45  ;;  %v312_v62 = vpop.f32.mrb[3].mxu0  ;;  %v355_v63 = vpop.f32.mrb[3].mxu1  ;;  %v2656_v50 = vld [vmem:[#allocation4] sm:$0xff]   ;;  %v2659_v53 = vld [vmem:[#allocation4 + $0xc8] sm:$0xff]  }
 0x11f   :  { %v313_v1 = vadd.f32 %v312_v62, %v93_v46  ;;  %v356_v2 = vadd.f32 %v355_v63, %v101_v47  ;;  %v359_v5 = vmax.f32 %v309_v54, 0.0  ;;  %v361_v6 = vmax.f32 %v352_v55, 0.0  ;;  %v2657_v51 = vld [vmem:[#allocation4 + $0x80] sm:$0xff]   ;;  %v2660_v54 = vld [vmem:[#allocation4 + $0x8] sm:$0xff]   ;;  %v2662_v56 = vld [vmem:[#allocation4 + $0x50] sm:$0xff]  }
 0x120   :  { %v362_v3 = vmax.f32 %v311_v60, 0.0  ;;  %v364_v4 = vmax.f32 %v354_v61, 0.0  ;;  %v2661_v55 = vld [vmem:[#allocation4 + $0x88] sm:$0xff]   ;;  %v2663_v57 = vld [vmem:[#allocation4 + $0xd0] sm:$0xff]   ;;  %v2666_v60 = vld [vmem:[#allocation4 + $0x58] sm:$0xff]  }
 0x121   :  { %v363_v7 = vmax.f32 %v313_v1, 0.0  ;;  %v365_v8 = vmax.f32 %v356_v2, 0.0  ;;  %v2667_v61 = vld [vmem:[#allocation4 + $0xd8] sm:$0xff]   ;;  %v2670_v1 = vld [vmem:[#allocation4 + $0x60] sm:$0xff]  }
 0x122   :  { %v2922_v9 = vpack.c.bf16 %v362_v3, %v358_v58  ;;  %v2924_v10 = vpack.c.bf16 %v364_v4, %v360_v59  ;;  %v2664_v58 = vld [vmem:[#allocation4 + $0x10] sm:$0xff]   ;;  %v2668_v62 = vld [vmem:[#allocation4 + $0x18] sm:$0xff]   ;;  %v2671_v2 = vld [vmem:[#allocation4 + $0xe0] sm:$0xff]  }
 0x123   :  { %v367_v11 = vpack.c.bf16 %v363_v7, %v359_v5  ;;  %v369_v12 = vpack.c.bf16 %v365_v8, %v361_v6  ;;  %v2665_v59 = vld [vmem:[#allocation4 + $0x90] sm:$0xff]   ;;  %v2669_v63 = vld [vmem:[#allocation4 + $0x98] sm:$0xff]   ;;  %v2672_v3 = vld [vmem:[#allocation4 + $0x20] sm:$0xff]  }
 0x124   :  { %v2673_v4 = vld [vmem:[#allocation4 + $0xa0] sm:$0xff]   ;;  %v2674_v5 = vld [vmem:[#allocation4 + $0x68] sm:$0xff]  }
 0x125   :  { %v2675_v6 = vld [vmem:[#allocation4 + $0xe8] sm:$0xff]  }
 0x126   :  { %v2676_v7 = vld [vmem:[#allocation4 + $0x28] sm:$0xff]  }
 0x127   :  { %v2677_v8 = vld [vmem:[#allocation4 + $0xa8] sm:$0xff]  }
 0x13b   :  { %v682_v18 = vpop.f32.mrb[4].mxu0  ;;  %v725_v19 = vpop.f32.mrb[4].mxu1 }
 0x13c   :  { %v683_v20 = vadd.f32 %v682_v18, %v471_v14  ;;  %v726_v21 = vadd.f32 %v725_v19, %v479_v15  ;;  %v684_v22 = vpop.f32.mrb[5].mxu0  ;;  %v727_v23 = vpop.f32.mrb[5].mxu1  ;;  %v2685_v18 = vld [vmem:[#allocation4 + $0xb8] sm:$0xff]   ;;  %v2688_v19 = vld [vmem:[#allocation2 + $0x24] ss:$48 sps:$4 sm:$0xff]  }
 0x13d   :  { %v685_v24 = vadd.f32 %v684_v22, %v475_v16  ;;  %v728_v25 = vadd.f32 %v727_v23, %v483_v17  ;;  %v686_v26 = vpop.f32.mrb[6].mxu0  ;;  %v729_v27 = vpop.f32.mrb[6].mxu1  ;;  %v2689_v22 = vld [vmem:[#allocation2 + $0x28] ss:$48 sps:$4 sm:$0xff]   ;;  %v2694_v23 = vld [vmem:[#allocation2 + $0x84] ss:$48 sps:$4 sm:$0xff]  }
 0x13e   :  { %v687_v28 = vadd.f32 %v686_v26, %v471_v14  ;;  %v730_v29 = vadd.f32 %v729_v27, %v479_v15  ;;  %v688_v30 = vpop.f32.mrb[7].mxu0  ;;  %v731_v31 = vpop.f32.mrb[7].mxu1  ;;  %v734_v34 = vmax.f32 %v683_v20, 0.0  ;;  %v736_v35 = vmax.f32 %v726_v21, 0.0  ;;  %v2681_v14 = vld [vmem:[#allocation4 + $0xb0] sm:$0xff]   ;;  %v2682_v15 = vld [vmem:[#allocation4 + $0x78] sm:$0xff]  }
 0x13f   :  { %v689_v32 = vadd.f32 %v688_v30, %v475_v16  ;;  %v732_v33 = vadd.f32 %v731_v31, %v483_v17  ;;  %v735_v38 = vmax.f32 %v685_v24, 0.0  ;;  %v737_v41 = vmax.f32 %v728_v25, 0.0  ;;  %v2683_v16 = vld [vmem:[#allocation4 + $0xf8] sm:$0xff]   ;;  %v2686_v21 = vld [vmem:[#allocation2 + $0x20] ss:$48 sps:$4 sm:$0xff]  }
 0x140   :  { %v738_v36 = vmax.f32 %v687_v28, 0.0  ;;  %v740_v37 = vmax.f32 %v730_v29, 0.0  ;;  %v2684_v17 = vld [vmem:[#allocation4 + $0x38] sm:$0xff]   ;;  %v2692_v25 = vld [vmem:[#allocation2 + $0x80] ss:$48 sps:$4 sm:$0xff]  }
 0x141   :  { %v739_v44 = vmax.f32 %v689_v32, 0.0  ;;  %v741_v45 = vmax.f32 %v732_v33, 0.0  ;;  %v2691_v20 = vld [vmem:[#allocation2 + $0x2c] ss:$48 sps:$4 sm:$0xff]   ;;  %v2695_v26 = vld [vmem:[#allocation2 + $0x88] ss:$48 sps:$4 sm:$0xff]  }
 0x142   :  { %v742_v46 = vpack.c.bf16 %v738_v36, %v734_v34  ;;  %v744_v47 = vpack.c.bf16 %v740_v37, %v736_v35  ;;  %v2697_v24 = vld [vmem:[#allocation2 + $0x8c] ss:$48 sps:$4 sm:$0xff]   ;;  %v2700_v27 = vld [vmem:[#allocation2 + $0xe4] ss:$48 sps:$4 sm:$0xff]   ;;  %v2698_v29 = vld [vmem:[#allocation2 + $0xe0] ss:$48 sps:$4 sm:$0xff]  }
 0x143   :  { %v743_v48 = vpack.c.bf16 %v739_v44, %v735_v38  ;;  %v745_v49 = vpack.c.bf16 %v741_v45, %v737_v41  ;;  %v2703_v28 = vld [vmem:[#allocation2 + $0xec] ss:$48 sps:$4 sm:$0xff]   ;;  %v2701_v30 = vld [vmem:[#allocation2 + $0xe8] ss:$48 sps:$4 sm:$0xff]   ;;  %v2704_v31 = vld [vmem:[#allocation2 + $0x140] ss:$48 sps:$4 sm:$0xff]  }
 0x144   :  { %v2707_v32 = vld [vmem:[#allocation2 + $0x148] ss:$48 sps:$4 sm:$0xff]   ;;  %v2712_v33 = vld [vmem:[#allocation2 + $0x1a4] ss:$48 sps:$4 sm:$0xff]   ;;  %v2715_v34 = vld [vmem:[#allocation2 + $0x1ac] ss:$48 sps:$4 sm:$0xff]  }
 0x145   :  { %1034 = vmatprep.mubr.bf16.mxu0 %v743_v48  ;;  %1075 = vmatprep.mubr.bf16.mxu1 %v745_v49  ;;  %v2710_v35 = vld [vmem:[#allocation2 + $0x1a0] ss:$48 sps:$4 sm:$0xff]   ;;  %v2718_v36 = vld [vmem:[#allocation2 + $0x204] ss:$48 sps:$4 sm:$0xff]   ;;  %v2721_v37 = vld [vmem:[#allocation2 + $0x20c] ss:$48 sps:$4 sm:$0xff]  }
 0x146   :  { %1035 = vmatmul.mubr.bf16.vlgmr.msra.gmra.mrb[8].mxu0 %v742_v46  ;;  %1076 = vmatmul.mubr.bf16.vlgmr.msra.gmra.mrb[8].mxu1 %v744_v47  ;;  %v2716_v38 = vld [vmem:[#allocation2 + $0x200] ss:$48 sps:$4 sm:$0xff]   ;;  %v2719_v41 = vld [vmem:[#allocation2 + $0x208] ss:$48 sps:$4 sm:$0xff]   ;;  %v2724_v44 = vld [vmem:[#allocation2 + $0x264] ss:$48 sps:$4 sm:$0xff]  }
 0x147   :  { %2400 = vmatpush3.bf16.msra.mxu0 %v2656_v50  ;;  %2422 = vmatpush3.bf16.msra.mxu1 %v2657_v51  ;;  %v2727_v45 = vld [vmem:[#allocation2 + $0x26c] ss:$48 sps:$4 sm:$0xff]   ;;  %v2722_v46 = vld [vmem:[#allocation2 + $0x260] ss:$48 sps:$4 sm:$0xff]   ;;  %v2725_v47 = vld [vmem:[#allocation2 + $0x268] ss:$48 sps:$4 sm:$0xff]  }
 0x148   :  { %1308 = vmatprep.mubr.bf16.mxu0 %v367_v11  ;;  %1349 = vmatprep.mubr.bf16.mxu1 %v369_v12  ;;  %v2678_v11 = vld [vmem:[#allocation4 + $0x70] sm:$0xff]   ;;  %v2733_v49 = vld [vmem:[#allocation2 + $0x2cc] ss:$48 sps:$4 sm:$0xff]   ;;  %v2731_v51 = vld [vmem:[#allocation2 + $0x2c8] ss:$48 sps:$4 sm:$0xff]  }
 0x149   :  { %2401 = vmatprep.subr.bf16.mxu0 %v2658_v52  ;;  %2423 = vmatprep.subr.bf16.mxu1 %v2659_v53  ;;  %v2679_v12 = vld [vmem:[#allocation4 + $0xf0] sm:$0xff]   ;;  %v2782_v52 = vld [vmem:[%s2973_s0] sm:$0xff]  }
 0x14a   :  { %v2730_v48 = vld [vmem:[#allocation2 + $0x2c4] ss:$48 sps:$4 sm:$0xff]   ;;  %v2728_v50 = vld [vmem:[#allocation2 + $0x2c0] ss:$48 sps:$4 sm:$0xff]  }
 0x14b   :  { %2402 = vmatpush3.bf16.msra.mxu0 %v2660_v54  ;;  %2424 = vmatpush3.bf16.msra.mxu1 %v2661_v55  ;;  %v2734_v53 = vld [vmem:[#allocation4 + $0x240] sm:$0xff]  }
 0x14c   :  { %2403 = vmatprep.subr.bf16.mxu0 %v2662_v56  ;;  %2425 = vmatprep.subr.bf16.mxu1 %v2663_v57  ;;  %v2735_v54 = vld [vmem:[#allocation4 + $0x2c0] sm:$0xff]   ;;  %v2738_v57 = vld [vmem:[#allocation4 + $0x248] sm:$0xff]  }
 0x14d   :  { %v2736_v55 = vld [vmem:[#allocation4 + $0x200] sm:$0xff]  }
 0x14e   :  { %v2737_v56 = vld [vmem:[#allocation4 + $0x280] sm:$0xff]  }
 0x14f   :  { %2404 = vmatpush3.bf16.msra.mxu0 %v2664_v58  ;;  %2426 = vmatpush3.bf16.msra.mxu1 %v2665_v59  ;;  %v2739_v58 = vld [vmem:[#allocation4 + $0x2c8] sm:$0xff]  }
 0x150   :  { %2405 = vmatprep.subr.bf16.mxu0 %v2666_v60  ;;  %2427 = vmatprep.subr.bf16.mxu1 %v2667_v61  ;;  %v2740_v59 = vld [vmem:[#allocation4 + $0x208] sm:$0xff]   ;;  %v2742_v61 = vld [vmem:[#allocation4 + $0x250] sm:$0xff]  }
 0x151   :  { %v2741_v60 = vld [vmem:[#allocation4 + $0x288] sm:$0xff]  }
 0x153   :  { %2406 = vmatpush3.bf16.msra.mxu0 %v2668_v62  ;;  %2428 = vmatpush3.bf16.msra.mxu1 %v2669_v63  ;;  %v2743_v62 = vld [vmem:[#allocation4 + $0x2d0] sm:$0xff]  }
 0x154   :  { %2407 = vmatprep.subr.bf16.mxu0 %v2670_v1  ;;  %2429 = vmatprep.subr.bf16.mxu1 %v2671_v2  ;;  %v2744_v63 = vld [vmem:[#allocation4 + $0x210] sm:$0xff]   ;;  %v2746_v2 = vld [vmem:[#allocation4 + $0x258] sm:$0xff]  }
 0x155   :  { %v2745_v1 = vld [vmem:[#allocation4 + $0x290] sm:$0xff]  }
 0x157   :  { %2408 = vmatpush3.bf16.msra.mxu0 %v2672_v3  ;;  %2430 = vmatpush3.bf16.msra.mxu1 %v2673_v4  ;;  %v2747_v3 = vld [vmem:[#allocation4 + $0x2d8] sm:$0xff]  }
 0x158   :  { %2409 = vmatprep.subr.bf16.mxu0 %v2674_v5  ;;  %2431 = vmatprep.subr.bf16.mxu1 %v2675_v6  ;;  %v2748_v4 = vld [vmem:[#allocation4 + $0x218] sm:$0xff]   ;;  %v2750_v6 = vld [vmem:[#allocation4 + $0x260] sm:$0xff]  }
 0x159   :  { %v2749_v5 = vld [vmem:[#allocation4 + $0x298] sm:$0xff]  }
 0x15b   :  { %2410 = vmatpush3.bf16.msra.mxu0 %v2676_v7  ;;  %2432 = vmatpush3.bf16.msra.mxu1 %v2677_v8  ;;  %v2751_v7 = vld [vmem:[#allocation4 + $0x2e0] sm:$0xff]  }
 0x15c   :  { %2411 = vmatprep.subr.bf16.mxu0 %v2678_v11  ;;  %2433 = vmatprep.subr.bf16.mxu1 %v2679_v12  ;;  %v2752_v8 = vld [vmem:[#allocation4 + $0x220] sm:$0xff]   ;;  %v2754_v12 = vld [vmem:[#allocation4 + $0x268] sm:$0xff]  }
 0x15d   :  { %v2753_v11 = vld [vmem:[#allocation4 + $0x2a0] sm:$0xff]  }
 0x15f   :  { %2412 = vmatpush3.bf16.msra.mxu0 %v2680_v13  ;;  %2434 = vmatpush3.bf16.msra.mxu1 %v2681_v14  ;;  %v2755_v13 = vld [vmem:[#allocation4 + $0x2e8] sm:$0xff]  }
 0x160   :  { %2413 = vmatprep.subr.bf16.mxu0 %v2682_v15  ;;  %2435 = vmatprep.subr.bf16.mxu1 %v2683_v16  ;;  %v2756_v14 = vld [vmem:[#allocation4 + $0x228] sm:$0xff]   ;;  %v2758_v16 = vld [vmem:[#allocation4 + $0x270] sm:$0xff]  }
 0x161   :  { %v2757_v15 = vld [vmem:[#allocation4 + $0x2a8] sm:$0xff]  }
 0x163   :  { %2414 = vmatpush3.bf16.msra.mxu0 %v2684_v17  ;;  %2436 = vmatpush3.bf16.msra.mxu1 %v2685_v18  ;;  %v2759_v17 = vld [vmem:[#allocation4 + $0x2f0] sm:$0xff]  }
 0x164   :  { %1572 = vmatprep.subr.bf16.mxu0 %v2688_v19  ;;  %1615 = vmatprep.subr.bf16.mxu1 %v2691_v20  ;;  %v2760_v18 = vld [vmem:[#allocation4 + $0x230] sm:$0xff]   ;;  %v2762_v20 = vld [vmem:[#allocation4 + $0x278] sm:$0xff]  }
 0x165   :  { %v2761_v19 = vld [vmem:[#allocation4 + $0x2b0] sm:$0xff]  }
 0x166   :  { %1309 = vmatmul.mubr.bf16.vlgmr.msra.gmra.mrb[12].mxu0 %v2922_v9  ;;  %1350 = vmatmul.mubr.bf16.vlgmr.msra.gmra.mrb[12].mxu1 %v2924_v10  ;;  %v2706_v9 = vld [vmem:[#allocation2 + $0x144] ss:$48 sps:$4 sm:$0xff]   ;;  %v2709_v10 = vld [vmem:[#allocation2 + $0x14c] ss:$48 sps:$4 sm:$0xff]  }
 0x167   :  { %1573 = vmatpush1.bf16.msra.mxu0 %v2686_v21  ;;  %1616 = vmatpush1.bf16.msra.mxu1 %v2689_v22  ;;  %v2763_v21 = vld [vmem:[#allocation4 + $0x2f8] sm:$0xff]  }
 0x168   :  { %1574 = vmatprep.subr.bf16.mxu0 %v2694_v23  ;;  %1617 = vmatprep.subr.bf16.mxu1 %v2697_v24  ;;  %v2764_v22 = vld [vmem:[#allocation4 + $0x238] sm:$0xff]   ;;  %v2838_v24 = vmov 0.0  }
 0x169   :  { %1604 = vmatprep.mubr.bf16.mxu0 %v2837_v0  ;;  %1647 = vmatprep.mubr.bf16.mxu1 %v2837_v0  ;;  %v2713_v0 = vld [vmem:[#allocation2 + $0x1a8] ss:$48 sps:$4 sm:$0xff]  }
 0x16a   :  { %v2765_v23 = vld [vmem:[#allocation4 + $0x2b8] sm:$0xff]  }
 0x16b   :  { %1575 = vmatpush1.bf16.msra.mxu0 %v2692_v25  ;;  %1618 = vmatpush1.bf16.msra.mxu1 %v2695_v26 }
 0x16c   :  { %1576 = vmatprep.subr.bf16.mxu0 %v2700_v27  ;;  %1619 = vmatprep.subr.bf16.mxu1 %v2703_v28 }
 0x16f   :  { %1577 = vmatpush1.bf16.msra.mxu0 %v2698_v29  ;;  %1620 = vmatpush1.bf16.msra.mxu1 %v2701_v30 }
 0x170   :  { %1578 = vmatprep.subr.bf16.mxu0 %v2706_v9  ;;  %1621 = vmatprep.subr.bf16.mxu1 %v2709_v10 }
 0x173   :  { %1579 = vmatpush1.bf16.msra.mxu0 %v2704_v31  ;;  %1622 = vmatpush1.bf16.msra.mxu1 %v2707_v32 }
 0x174   :  { %1580 = vmatprep.subr.bf16.mxu0 %v2712_v33  ;;  %1623 = vmatprep.subr.bf16.mxu1 %v2715_v34 }
 0x177   :  { %1581 = vmatpush1.bf16.msra.mxu0 %v2710_v35  ;;  %1624 = vmatpush1.bf16.msra.mxu1 %v2713_v0 }
 0x178   :  { %1582 = vmatprep.subr.bf16.mxu0 %v2718_v36  ;;  %1625 = vmatprep.subr.bf16.mxu1 %v2721_v37 }
 0x17b   :  { %1583 = vmatpush1.bf16.msra.mxu0 %v2716_v38  ;;  %1626 = vmatpush1.bf16.msra.mxu1 %v2719_v41 }
 0x17c   :  { %1584 = vmatprep.subr.bf16.mxu0 %v2724_v44  ;;  %1627 = vmatprep.subr.bf16.mxu1 %v2727_v45 }
 0x17f   :  { %1585 = vmatpush1.bf16.msra.mxu0 %v2722_v46  ;;  %1628 = vmatpush1.bf16.msra.mxu1 %v2725_v47 }
 0x180   :  { %1586 = vmatprep.subr.bf16.mxu0 %v2730_v48  ;;  %1629 = vmatprep.subr.bf16.mxu1 %v2733_v49 }
 0x183   :  { %1587 = vmatpush1.bf16.msra.mxu0 %v2728_v50  ;;  %1630 = vmatpush1.bf16.msra.mxu1 %v2731_v51 }
 0x184   :  { %2443 = vmatprep.subr.bf16.mxu0 %v2734_v53  ;;  %2465 = vmatprep.subr.bf16.mxu1 %v2735_v54 }
 0x186   :  { %1605 = vmatmul.mubr.bf16.vlgmr.msra.gmra.mrb[16].mxu0 %v2782_v52  ;;  %1648 = vmatmul.mubr.bf16.vlgmr.msra.gmra.mrb[16].mxu1 %v2782_v52 }
 0x187   :  { %2444 = vmatpush3.bf16.msra.mxu0 %v2736_v55  ;;  %2466 = vmatpush3.bf16.msra.mxu1 %v2737_v56  ;;  %v1390_v56 = vld [vmem:[%s2975_s2 + $0x8] sm:$0xf] }
 0x188   :  { %2445 = vmatprep.subr.bf16.mxu0 %v2738_v57  ;;  %2467 = vmatprep.subr.bf16.mxu1 %v2739_v58  ;;  %v1395_v57 = vrot.slane %v1390_v56, %v2907_v39  ;;  %v1403_v58 = vrot.slane %v1390_v56, %v2909_v40 }
 0x18b   :  { %2446 = vmatpush3.bf16.msra.mxu0 %v2740_v59  ;;  %2468 = vmatpush3.bf16.msra.mxu1 %v2741_v60  ;;  %v1399_v59 = vrot.slane %v1390_v56, %v2914_v42  ;;  %v1407_v60 = vrot.slane %v1390_v56, %v2916_v43 }
 0x18c   :  { %2447 = vmatprep.subr.bf16.mxu0 %v2742_v61  ;;  %2469 = vmatprep.subr.bf16.mxu1 %v2743_v62 }
 0x18f   :  { %2448 = vmatpush3.bf16.msra.mxu0 %v2744_v63  ;;  %2470 = vmatpush3.bf16.msra.mxu1 %v2745_v1 }
 0x190   :  { %2449 = vmatprep.subr.bf16.mxu0 %v2746_v2  ;;  %2471 = vmatprep.subr.bf16.mxu1 %v2747_v3 }
 0x193   :  { %2450 = vmatpush3.bf16.msra.mxu0 %v2748_v4  ;;  %2472 = vmatpush3.bf16.msra.mxu1 %v2749_v5 }
 0x194   :  { %2451 = vmatprep.subr.bf16.mxu0 %v2750_v6  ;;  %2473 = vmatprep.subr.bf16.mxu1 %v2751_v7 }
 0x197   :  { %2452 = vmatpush3.bf16.msra.mxu0 %v2752_v8  ;;  %2474 = vmatpush3.bf16.msra.mxu1 %v2753_v11 }
 0x198   :  { %2453 = vmatprep.subr.bf16.mxu0 %v2754_v12  ;;  %2475 = vmatprep.subr.bf16.mxu1 %v2755_v13 }
 0x19b   :  { %2454 = vmatpush3.bf16.msra.mxu0 %v2756_v14  ;;  %2476 = vmatpush3.bf16.msra.mxu1 %v2757_v15 }
 0x19c   :  { %2455 = vmatprep.subr.bf16.mxu0 %v2758_v16  ;;  %2477 = vmatprep.subr.bf16.mxu1 %v2759_v17 }
 0x19f   :  { %2456 = vmatpush3.bf16.msra.mxu0 %v2760_v18  ;;  %2478 = vmatpush3.bf16.msra.mxu1 %v2761_v19 }
 0x1a0   :  { %2457 = vmatprep.subr.bf16.mxu0 %v2762_v20  ;;  %2479 = vmatprep.subr.bf16.mxu1 %v2763_v21 }
 0x1a3   :  { %2458 = vmatpush3.bf16.msra.mxu0 %v2764_v22  ;;  %2480 = vmatpush3.bf16.msra.mxu1 %v2765_v23 }
 0x1a4   :  { %2496 = vmatprep.subr.bf16.mxu0 %v2838_v24 }
 0x219   :  { %v2371_v25 = vpop.f32.mrb[8].mxu0  ;;  %v2393_v26 = vpop.f32.mrb[8].mxu1 }
 0x21a   :  { %v2372_v27 = vpop.f32.mrb[9].mxu0  ;;  %v2394_v28 = vpop.f32.mrb[9].mxu1 }
 0x21b   :  { %v2373_v29 = vadd.f32 %v2372_v27, %v2371_v25  ;;  %v2395_v30 = vadd.f32 %v2394_v28, %v2393_v26  ;;  %v2374_v9 = vpop.f32.mrb[10].mxu0  ;;  %v2396_v10 = vpop.f32.mrb[10].mxu1  ;;  %v2766_v27 = vld [vmem:[#allocation4 + $0x300] sm:$0xff]   ;;  %v2767_v28 = vld [vmem:[#allocation4 + $0x308] sm:$0xff]  }
 0x21c   :  { %v2375_v31 = vpop.f32.mrb[11].mxu0  ;;  %v2397_v32 = vpop.f32.mrb[11].mxu1 }
 0x21d   :  { %v1078_v33 = vadd.f32 %v2395_v30, %v2373_v29  ;;  %v2376_v34 = vadd.f32 %v2375_v31, %v2374_v9  ;;  %v2398_v35 = vadd.f32 %v2397_v32, %v2396_v10  ;;  %v2768_v29 = vld [vmem:[#allocation4 + $0x310] sm:$0xff]   ;;  %v2769_v30 = vld [vmem:[#allocation4 + $0x318] sm:$0xff]   ;;  %v2770_v9 = vld [vmem:[#allocation4 + $0x320] sm:$0xff]  }
 0x21e   :  { %v2771_v10 = vld [vmem:[#allocation4 + $0x328] sm:$0xff]   ;;  %v2772_v31 = vld [vmem:[#allocation4 + $0x330] sm:$0xff]   ;;  %v2773_v32 = vld [vmem:[#allocation4 + $0x338] sm:$0xff]  }
 0x21f   :  { %v1081_v0 = vadd.f32 %v2398_v35, %v2376_v34 }
 0x239   :  { %v2415_v36 = vpop.f32.mrb[12].mxu0  ;;  %v2437_v37 = vpop.f32.mrb[12].mxu1 }
 0x23a   :  { %v2416_v38 = vpop.f32.mrb[13].mxu0  ;;  %v2438_v41 = vpop.f32.mrb[13].mxu1 }
 0x23b   :  { %v2417_v44 = vadd.f32 %v2416_v38, %v2415_v36  ;;  %v2439_v45 = vadd.f32 %v2438_v41, %v2437_v37  ;;  %v2418_v46 = vpop.f32.mrb[14].mxu0  ;;  %v2440_v47 = vpop.f32.mrb[14].mxu1 }
 0x23c   :  { %v2419_v48 = vpop.f32.mrb[15].mxu0  ;;  %v2441_v49 = vpop.f32.mrb[15].mxu1 }
 0x23d   :  { %v1311_v50 = vadd.f32 %v2417_v44, %v1078_v33  ;;  %v2420_v51 = vadd.f32 %v2419_v48, %v2418_v46  ;;  %v2442_v52 = vadd.f32 %v2441_v49, %v2440_v47 }
 0x23f   :  { %v2941_v53 = vadd.f32 %v2439_v45, %v1311_v50  ;;  %v1314_v54 = vadd.f32 %v2420_v51, %v1081_v0  ;;  %v51_v0 = vld [vmem:[%s2977_s4] sm:$0x3] }
 0x240   :  { %v2013_v48 = vrot.slane %v51_v0, %v2907_v39 }
 0x241   :  { %v2943_v55 = vadd.f32 %v2442_v52, %v1314_v54 }
 0x259   :  { %v1606_v61 = vpop.f32.mrb[16].mxu0  ;;  %v1649_v62 = vpop.f32.mrb[16].mxu1 }
 0x25a   :  { %v1607_v63 = vadd.f32 %v1606_v61, %v1395_v57  ;;  %v1650_v1 = vadd.f32 %v1649_v62, %v1403_v58  ;;  %v1608_v2 = vpop.f32.mrb[17].mxu0  ;;  %v1651_v3 = vpop.f32.mrb[17].mxu1 }
 0x25b   :  { %v1609_v4 = vadd.f32 %v1608_v2, %v1399_v59  ;;  %v1652_v5 = vadd.f32 %v1651_v3, %v1407_v60  ;;  %v1610_v6 = vpop.f32.mrb[18].mxu0  ;;  %v1653_v7 = vpop.f32.mrb[18].mxu1 }
 0x25c   :  { %v1611_v8 = vadd.f32 %v1610_v6, %v1395_v57  ;;  %v1654_v11 = vadd.f32 %v1653_v7, %v1403_v58  ;;  %v1612_v12 = vpop.f32.mrb[19].mxu0  ;;  %v1655_v13 = vpop.f32.mrb[19].mxu1  ;;  %v1658_v15 = vmax.f32 %v1607_v63, 0.0  ;;  %v1660_v16 = vmax.f32 %v1650_v1, 0.0 }
 0x25d   :  { %v1613_v14 = vadd.f32 %v1612_v12, %v1399_v59  ;;  %v1656_v40 = vadd.f32 %v1655_v13, %v1407_v60  ;;  %v1659_v18 = vmax.f32 %v1609_v4, 0.0  ;;  %v1661_v19 = vmax.f32 %v1652_v5, 0.0 }
 0x25e   :  { %v1662_v17 = vmax.f32 %v1611_v8, 0.0  ;;  %v1664_v43 = vmax.f32 %v1654_v11, 0.0  ;;  %v2038_v60 = vrot.slane %v51_v0, %v2914_v42 }
 0x25f   :  { %v1663_v20 = vmax.f32 %v1613_v14, 0.0  ;;  %v1665_v21 = vmax.f32 %v1656_v40, 0.0 }
 0x260   :  { %v1666_v22 = vpack.c.bf16 %v1662_v17, %v1658_v15  ;;  %v1668_v23 = vpack.c.bf16 %v1664_v43, %v1660_v16 }
 0x261   :  { %v1667_v25 = vpack.c.bf16 %v1663_v20, %v1659_v18  ;;  %v1669_v26 = vpack.c.bf16 %v1665_v21, %v1661_v19 }
 0x263   :  { %1958 = vmatprep.mubr.bf16.mxu0 %v1667_v25  ;;  %1999 = vmatprep.mubr.bf16.mxu1 %v1669_v26 }
 0x264   :  { %1959 = vmatmul.mubr.bf16.vlgmr.msra.gmra.mrb[20].mxu0 %v1666_v22  ;;  %2000 = vmatmul.mubr.bf16.vlgmr.msra.gmra.mrb[20].mxu1 %v1668_v23 }
 0x265   :  { %2497 = vmatpush3.bf16.msra.mxu0 %v2766_v27  ;;  %2512 = vmatprep.mubr.msk.bf16.mxu0 %vm2839_vm0, %v2838_v24 }
 0x266   :  { %2498 = vmatprep.subr.bf16.mxu0 %v2838_v24 }
 0x269   :  { %2499 = vmatpush3.bf16.msra.mxu0 %v2767_v28 }
 0x26a   :  { %2500 = vmatprep.subr.bf16.mxu0 %v2838_v24 }
 0x26d   :  { %2501 = vmatpush3.bf16.msra.mxu0 %v2768_v29 }
 0x26e   :  { %2502 = vmatprep.subr.bf16.mxu0 %v2838_v24 }
 0x271   :  { %2503 = vmatpush3.bf16.msra.mxu0 %v2769_v30 }
 0x272   :  { %2504 = vmatprep.subr.bf16.mxu0 %v2838_v24 }
 0x275   :  { %2505 = vmatpush3.bf16.msra.mxu0 %v2770_v9 }
 0x276   :  { %2506 = vmatprep.subr.bf16.mxu0 %v2838_v24 }
 0x279   :  { %2507 = vmatpush3.bf16.msra.mxu0 %v2771_v10 }
 0x27a   :  { %2508 = vmatprep.subr.bf16.mxu0 %v2838_v24 }
 0x27d   :  { %2509 = vmatpush3.bf16.msra.mxu0 %v2772_v31 }
 0x27e   :  { %2510 = vmatprep.subr.bf16.mxu0 %v2838_v24 }
 0x281   :  { %2511 = vmatpush3.bf16.msra.mxu0 %v2773_v32 }
 0x337   :  { %v2459_v33 = vpop.f32.mrb[20].mxu0  ;;  %v2481_v34 = vpop.f32.mrb[20].mxu1 }
 0x338   :  { %v2460_v35 = vpop.f32.mrb[21].mxu0  ;;  %v2482_v36 = vpop.f32.mrb[21].mxu1 }
 0x339   :  { %v2461_v37 = vadd.f32 %v2460_v35, %v2459_v33  ;;  %v2483_v38 = vadd.f32 %v2482_v36, %v2481_v34  ;;  %v2462_v41 = vpop.f32.mrb[22].mxu0  ;;  %v2484_v44 = vpop.f32.mrb[22].mxu1 }
 0x33a   :  { %v2463_v45 = vpop.f32.mrb[23].mxu0  ;;  %v2485_v46 = vpop.f32.mrb[23].mxu1 }
 0x33b   :  { %v2002_v47 = vadd.f32 %v2483_v38, %v2461_v37  ;;  %v2464_v49 = vadd.f32 %v2463_v45, %v2462_v41  ;;  %v2486_v50 = vadd.f32 %v2485_v46, %v2484_v44 }
 0x33d   :  { %v2008_v24 = vadd.f32 %v2002_v47, %v2941_v53  ;;  %v2005_v51 = vadd.f32 %v2486_v50, %v2464_v49 }
 0x33f   :  { %v2014_v52 = vadd.f32 %v2013_v48, %v2008_v24  ;;  %v2009_v54 = vadd.f32 %v2005_v51, %v2943_v55 }
 0x341   :  { %v2015_v56 = vadd.f32 %v2013_v48, %v2009_v54  ;;  %v2016_v57 = vmax.f32 %v2014_v52, 0.0 }
 0x343   :  { %v2017_v58 = vmax.f32 %v2015_v56, 0.0 }
 0x345   :  { %v2018_v59 = vpack.c.bf16 %v2017_v58, %v2016_v57 }
 0x347   :  { %2513 = vmatmul.mubr.bf16.vlgmr.msra.gmra.mrb[24].mxu0 %v2018_v59 }
 0x41a   :  { %v2121_v61 = vpop.f32.mrb[24].mxu0 }
 0x41b   :  { %v2122_v62 = vadd.f32 %v2121_v61, %v2038_v60  ;;  %v2514_v63 = vpop.f32.mrb[25].mxu0 }
 0x41c   :  { %v2124_v1 = vpop.f32.mrb[26].mxu0 }
 0x41d   :  { %v2125_v39 = vadd.f32 %v2124_v1, %v2038_v60  ;;  %2128 = vmax.xlane.f32.xlu0 %v2122_v62  ;;  %v2515_v2 = vpop.f32.mrb[27].mxu0 }
 0x421   :  { %2130 = vmax.xlane.f32.xlu0 %v2125_v39 }
 0x4aa   :  { %v2129_v53 = vpop.xlane.xlu0 %2128 }
 0x4ab   :  { %v2132_v3 = vsub.f32 %v2122_v62, %v2129_v53 }
 0x4ad   :  { %v2134_v4 = vmul.f32 1.442695, %v2132_v3 }
 0x4ae   :  { %v2131_v5 = vpop.xlane.xlu0 %2130 }
 0x4af   :  { %2774 = vpow2.f32 %v2134_v4  ;;  %v2133_v55 = vsub.f32 %v2125_v39, %v2131_v5 }
 0x4b1   :  { %v2136_v6 = vmul.f32 1.442695, %v2133_v55 }
 0x4b3   :  { %2776 = vpow2.f32 %v2136_v6 }
 0x4b9   :  { %v2775_v7 = vpop.eup %2774 }
 0x4ba   :  { %2138 = vadd.xlane.f32.xlu1 %v2775_v7 }
 0x4bd   :  { %v2777_v8 = vpop.eup %2776 }
 0x4be   :  { %2140 = vadd.xlane.f32.xlu1 %v2777_v8 }
 0x547   :  { %v2139_v42 = vpop.xlane.xlu1 %2138 }
 0x548   :  { %2778 = vrcp.f32 %v2139_v42 }
 0x54b   :  { %v2141_v11 = vpop.xlane.xlu1 %2140 }
 0x54c   :  { %2780 = vrcp.f32 %v2141_v11 }
 0x552   :  { %v2779_v12 = vpop.eup %2778 }
 0x553   :  { %v2144_v13 = vmul.f32 %v2779_v12, %v2775_v7 }
 0x555   :  { %2146 = vst [vmem:[%s2978_s5] sm:$0xff] %v2144_v13 }
 0x556   :  { %v2781_v14 = vpop.eup %2780 }
 0x557   :  { %v2145_v40 = vmul.f32 %v2781_v14, %v2777_v8 }
 0x559   :  { %2147 = vst [vmem:[%s2978_s5 + $0x8] sm:$0xff] %v2145_v40 }
 0x55a   :  { %2152 = vsyncpa [#allocation3], 1 }
 0x55b   :  { %2153 = vsyncpa [#allocation5], 1 }

</bundles_post_ra>
